<compile_context>
chip_gen: v7x
topology: tpu7x:2x2x1
jax: 0.10.0
libtpu: 0.0.40
codegen_flags: <defaults>
</compile_context>

<pallas_src>
import functools

import jax
import jax.numpy as jnp
from jax import lax
from jax.experimental import pallas as pl
from jax.experimental.pallas import tpu as pltpu


def _round_up(x, m):
    return (x + m - 1) // m * m


def _sepconv_kernel(x_ref, dw_ref, pw_ref, shift_ref, out_ref, *,
                    KH, KW, W_pad, L, C_in, C_out, c_chunk, use_mxu):
    """One whole image per grid step (grid = (N,)).

    x_ref    : (C_in, Lin)    VMEM f32, flat padded image (row stride W_pad,
                              tail-padded by KW-1 so every tap slice has length L)
    dw_ref   : (C_in, KH*KW)  VMEM f32, depthwise taps (per-channel columns)
    pw_ref   : (C_out, C_in)  VMEM f32, pointwise weights with BN scale folded in
    shift_ref: (C_out, 1)     VMEM f32, folded BN shift
    out_ref  : (C_out, L)     VMEM, flat output slab; one lane-dense store/step
    """
    # BN shift seeds the output accumulator (broadcast hoisted out of all loops).
    out = jnp.broadcast_to(shift_ref[...], (C_out, L)).astype(jnp.float32)

    # Input channels processed in sublane-sized chunks so live vregs stay
    # bounded when C_in grows (32-64 in later cell stages).
    for c0 in range(0, C_in, c_chunk):
        cs = min(c_chunk, C_in - c0)

        # Depthwise conv on flat (H*W) lanes: each tap is a static lane-offset
        # slice of the ref, FMA'd on a (cs, L) slab in f32.
        acc = None
        for kh in range(KH):
            for kw in range(KW):
                off = kh * W_pad + kw
                xs = x_ref[pl.ds(c0, cs), pl.ds(off, L)]               # (cs, L)
                tap = dw_ref[pl.ds(c0, cs), pl.ds(kh * KW + kw, 1)]    # (cs, 1)
                term = xs * tap
                acc = term if acc is None else acc + term

        # Pointwise 1x1 (BN scale pre-folded), fused per chunk.
        if use_mxu:
            pw_c = pw_ref[:, pl.ds(c0, cs)]                            # (C_out, cs)
            out = out + lax.dot_general(pw_c, acc, (((1,), (0,)), ((), ())),
                                        preferred_element_type=jnp.float32)
        else:
            for j in range(cs):
                pw_col = pw_ref[:, pl.ds(c0 + j, 1)]                   # (C_out, 1)
                out = out + acc[j:j + 1, :] * pw_col                   # (C_out, L)

    out_ref[...] = out.astype(out_ref.dtype)


def separable_conv2d(x_nchw, dw_w, pw_w, gamma, beta, *, stride, padding,
                     eps=1e-5, running_mean=None, running_var=None):
    """x_nchw: (N, C_in, H, W). dw_w: (C_in, 1, KH, KW). pw_w: (C_out, C_in, 1, 1)."""
    N, C_in, H, W = x_nchw.shape
    C_out = pw_w.shape[0]
    KH, KW = int(dw_w.shape[2]), int(dw_w.shape[3])

    H_pad, W_pad = H + 2 * padding, W + 2 * padding
    H1, W1 = H_pad - KH + 1, W_pad - KW + 1       # stride-1 output extent
    L = H1 * W_pad                                # flat output slab length
    Lin = H_pad * W_pad + (KW - 1)                # flat input length (+ tail pad)

    # Wrapper-side layout plumbing: zero-pad, flatten H*W onto lanes, cast to
    # f32 once (no per-tap converts in-kernel, no bf16 math on v5e).
    x_pad = jnp.pad(x_nchw.astype(jnp.float32),
                    ((0, 0), (0, 0), (padding, padding), (padding, padding)))
    x_flat = x_pad.reshape(N, C_in, H_pad * W_pad)
    x_flat = jnp.pad(x_flat, ((0, 0), (0, 0), (0, KW - 1)))

    # Inference-mode BN fold: scale into pointwise weights, shift kept separate.
    rm = jnp.zeros((C_out,), jnp.float32) if running_mean is None else running_mean.astype(jnp.float32)
    rv = jnp.ones((C_out,), jnp.float32) if running_var is None else running_var.astype(jnp.float32)
    scale = gamma.astype(jnp.float32) / jnp.sqrt(rv + eps)                   # (C_out,)
    shift = (beta.astype(jnp.float32) - rm * scale).reshape(C_out, 1)        # (C_out, 1)
    pw_scaled = pw_w[:, :, 0, 0].astype(jnp.float32) * scale[:, None]        # (C_out, C_in)
    dw_flat = dw_w[:, 0, :, :].reshape(C_in, KH * KW).astype(jnp.float32)    # (C_in, KH*KW)

    c_chunk = min(C_in, 8)
    use_mxu = min(C_in, C_out) >= 32   # VPU broadcast path for tiny NAS channels

    # VMEM budget from (8,128)-tile-padded block sizes (double-buffered).
    def _padded_bytes(s, l):
        return _round_up(s, 8) * _round_up(l, 128) * 4
    blk_bytes = (_padded_bytes(C_in, Lin) + _padded_bytes(C_out, L)
                 + _padded_bytes(C_in, KH * KW) + _padded_bytes(C_out, C_in)
                 + _padded_bytes(C_out, 1))
    vmem_limit = int(min(48 * 2 ** 20, max(4 * 2 ** 20, 2 * blk_bytes + (2 << 20))))

    kernel = functools.partial(_sepconv_kernel, KH=KH, KW=KW, W_pad=W_pad, L=L,
                               C_in=C_in, C_out=C_out, c_chunk=c_chunk,
                               use_mxu=use_mxu)

    out_flat = pl.pallas_call(
        kernel,
        out_shape=jax.ShapeDtypeStruct((N, C_out, L), x_nchw.dtype),
        grid=(N,),
        in_specs=[
            pl.BlockSpec((None, C_in, Lin), lambda n: (n, 0, 0)),   # flat image
            pl.BlockSpec((C_in, KH * KW), lambda n: (0, 0)),        # depthwise taps
            pl.BlockSpec((C_out, C_in), lambda n: (0, 0)),          # pointwise * BN scale
            pl.BlockSpec((C_out, 1), lambda n: (0, 0)),             # BN shift
        ],
        out_specs=pl.BlockSpec((None, C_out, L), lambda n: (n, 0, 0)),
        compiler_params=pltpu.CompilerParams(
            dimension_semantics=("parallel",),
            vmem_limit_bytes=vmem_limit,
        ),
    )(x_flat, dw_flat, pw_scaled, shift)

    # Drop the junk columns introduced by the W_pad row stride (tiny XLA slice).
    out = out_flat.reshape(N, C_out, H1, W_pad)[:, :, :, :W1]
    if stride != 1:
        # TODO(synk): strided depthwise implemented as stride-1 + subsample.
        out = out[:, :, ::stride, ::stride]
    return out


def _reference(x, dw_w, pw_w, gamma, beta, *, stride, padding, eps=1e-5,
               running_mean=None, running_var=None):
    C_in = x.shape[1]
    C_out = pw_w.shape[0]
    dw = lax.conv_general_dilated(
        x, dw_w, (stride, stride), [(padding, padding)] * 2,
        dimension_numbers=("NCHW", "OIHW", "NCHW"), feature_group_count=C_in)
    pw = lax.conv_general_dilated(
        dw, pw_w, (1, 1), "VALID", dimension_numbers=("NCHW", "OIHW", "NCHW"))
    rm = jnp.zeros((C_out,), jnp.float32) if running_mean is None else running_mean
    rv = jnp.ones((C_out,), jnp.float32) if running_var is None else running_var
    scale = gamma / jnp.sqrt(rv + eps)
    return pw * scale.reshape(1, -1, 1, 1) + (beta - rm * scale).reshape(1, -1, 1, 1)


if __name__ == "__main__":
    N, C_in, C_out, H, W = 2, 4, 8, 16, 16
    kernel_size, padding = 3, 1

    key = jax.random.PRNGKey(0)
    kx, kd, kp, kg, kb, km, kv = jax.random.split(key, 7)
    x = jax.random.normal(kx, (N, C_in, H, W), dtype=jnp.float32)
    dw_w = jax.random.normal(kd, (C_in, 1, kernel_size, kernel_size), jnp.float32) * 0.1
    pw_w = jax.random.normal(kp, (C_out, C_in, 1, 1), jnp.float32) * 0.1
    gamma = 1.0 + 0.1 * jax.random.normal(kg, (C_out,), jnp.float32)
    beta = 0.1 * jax.random.normal(kb, (C_out,), jnp.float32)
    running_mean = 0.05 * jax.random.normal(km, (C_out,), jnp.float32)
    running_var = 1.0 + 0.2 * jnp.abs(jax.random.normal(kv, (C_out,), jnp.float32))

    # stride=1: the configuration SearchableCell uses for its sepconv3x3 edges.
    out = separable_conv2d(x, dw_w, pw_w, gamma, beta, stride=1, padding=padding)
    out = jax.block_until_ready(out)
    ref = _reference(x, dw_w, pw_w, gamma, beta, stride=1, padding=padding)
    assert out.shape == (N, C_out, H, W), out.shape
    assert jnp.allclose(out, ref, atol=1e-4, rtol=1e-4), float(jnp.max(jnp.abs(out - ref)))

    # stride=2: validates the conv + wrapper-subsample path.
    out2 = separable_conv2d(x, dw_w, pw_w, gamma, beta, stride=2, padding=padding)
    out2 = jax.block_until_ready(out2)
    ref2 = _reference(x, dw_w, pw_w, gamma, beta, stride=2, padding=padding)
    assert out2.shape == ref2.shape, (out2.shape, ref2.shape)
    assert jnp.allclose(out2, ref2, atol=1e-4, rtol=1e-4), float(jnp.max(jnp.abs(out2 - ref2)))

    # Non-trivial running-stats BN fold (flagged as untested in review).
    out3 = separable_conv2d(x, dw_w, pw_w, gamma, beta, stride=1, padding=padding,
                            running_mean=running_mean, running_var=running_var)
    out3 = jax.block_until_ready(out3)
    ref3 = _reference(x, dw_w, pw_w, gamma, beta, stride=1, padding=padding,
                      running_mean=running_mean, running_var=running_var)
    assert jnp.allclose(out3, ref3, atol=1e-4, rtol=1e-4), float(jnp.max(jnp.abs(out3 - ref3)))

    print("KERNEL_OK")
</pallas_src>

<mosaic_0001>
module attributes {stable_mosaic.version = 11 : i64} {
  func.func @_sepconv_kernel(%arg0: i32, %arg1: memref<1x4x326xf32, #tpu.memory_space<vmem>>, %arg2: memref<4x9xf32, #tpu.memory_space<vmem>>, %arg3: memref<8x4xf32, #tpu.memory_space<vmem>>, %arg4: memref<8x1xf32, #tpu.memory_space<vmem>>, %arg5: memref<1x8x288xf32, #tpu.memory_space<vmem>>) attributes {dimension_semantics = [#tpu.dimension_semantics<parallel>], iteration_bounds = array<i64: 2>, scalar_prefetch = 0 : i64, scratch_operands = 0 : i64, tpu.core_type = #tpu.core_type<tc>, window_params = [{transform_indices = @transform_0, window_bounds = array<i64: 1, 4, 326>}, {pipeline_mode = #tpu.pipeline_mode<synchronous>, transform_indices = @transform_1, window_bounds = array<i64: 4, 9>}, {pipeline_mode = #tpu.pipeline_mode<synchronous>, transform_indices = @transform_2, window_bounds = array<i64: 8, 4>}, {pipeline_mode = #tpu.pipeline_mode<synchronous>, transform_indices = @transform_3, window_bounds = array<i64: 8, 1>}, {transform_indices = @transform_4, window_bounds = array<i64: 1, 8, 288>}]} {
    %c0 = arith.constant 0 : index
    %c0_0 = arith.constant 0 : index
    %0 = vector.load %arg4[%c0, %c0_0] : memref<8x1xf32, #tpu.memory_space<vmem>>, vector<8x1xf32>
    %1 = vector.shape_cast %0 : vector<8x1xf32> to vector<8x1xf32>
    %2 = vector.broadcast %1 : vector<8x1xf32> to vector<8x288xf32>
    %c0_1 = arith.constant 0 : index
    %c0_2 = arith.constant 0 : index
    %c0_3 = arith.constant 0 : index
    %3 = vector.load %arg1[%c0_1, %c0_2, %c0_3] : memref<1x4x326xf32, #tpu.memory_space<vmem>>, vector<1x4x288xf32>
    %4 = vector.shape_cast %3 : vector<1x4x288xf32> to vector<4x288xf32>
    %c0_4 = arith.constant 0 : index
    %c0_5 = arith.constant 0 : index
    %5 = vector.load %arg2[%c0_4, %c0_5] : memref<4x9xf32, #tpu.memory_space<vmem>>, vector<4x1xf32>
    %6 = vector.broadcast %5 : vector<4x1xf32> to vector<4x288xf32>
    %7 = arith.mulf %4, %6 : vector<4x288xf32>
    %c0_6 = arith.constant 0 : index
    %c0_7 = arith.constant 0 : index
    %c1 = arith.constant 1 : index
    %8 = vector.load %arg1[%c0_6, %c0_7, %c1] : memref<1x4x326xf32, #tpu.memory_space<vmem>>, vector<1x4x288xf32>
    %9 = vector.shape_cast %8 : vector<1x4x288xf32> to vector<4x288xf32>
    %c0_8 = arith.constant 0 : index
    %c1_9 = arith.constant 1 : index
    %10 = vector.load %arg2[%c0_8, %c1_9] : memref<4x9xf32, #tpu.memory_space<vmem>>, vector<4x1xf32>
    %11 = vector.broadcast %10 : vector<4x1xf32> to vector<4x288xf32>
    %12 = arith.mulf %9, %11 : vector<4x288xf32>
    %13 = arith.addf %7, %12 : vector<4x288xf32>
    %c0_10 = arith.constant 0 : index
    %c0_11 = arith.constant 0 : index
    %c2 = arith.constant 2 : index
    %14 = vector.load %arg1[%c0_10, %c0_11, %c2] : memref<1x4x326xf32, #tpu.memory_space<vmem>>, vector<1x4x288xf32>
    %15 = vector.shape_cast %14 : vector<1x4x288xf32> to vector<4x288xf32>
    %c0_12 = arith.constant 0 : index
    %c2_13 = arith.constant 2 : index
    %16 = vector.load %arg2[%c0_12, %c2_13] : memref<4x9xf32, #tpu.memory_space<vmem>>, vector<4x1xf32>
    %17 = vector.broadcast %16 : vector<4x1xf32> to vector<4x288xf32>
    %18 = arith.mulf %15, %17 : vector<4x288xf32>
    %19 = arith.addf %13, %18 : vector<4x288xf32>
    %c0_14 = arith.constant 0 : index
    %c0_15 = arith.constant 0 : index
    %c18 = arith.constant 18 : index
    %20 = vector.load %arg1[%c0_14, %c0_15, %c18] : memref<1x4x326xf32, #tpu.memory_space<vmem>>, vector<1x4x288xf32>
    %21 = vector.shape_cast %20 : vector<1x4x288xf32> to vector<4x288xf32>
    %c0_16 = arith.constant 0 : index
    %c3 = arith.constant 3 : index
    %22 = vector.load %arg2[%c0_16, %c3] : memref<4x9xf32, #tpu.memory_space<vmem>>, vector<4x1xf32>
    %23 = vector.broadcast %22 : vector<4x1xf32> to vector<4x288xf32>
    %24 = arith.mulf %21, %23 : vector<4x288xf32>
    %25 = arith.addf %19, %24 : vector<4x288xf32>
    %c0_17 = arith.constant 0 : index
    %c0_18 = arith.constant 0 : index
    %c19 = arith.constant 19 : index
    %26 = vector.load %arg1[%c0_17, %c0_18, %c19] : memref<1x4x326xf32, #tpu.memory_space<vmem>>, vector<1x4x288xf32>
    %27 = vector.shape_cast %26 : vector<1x4x288xf32> to vector<4x288xf32>
    %c0_19 = arith.constant 0 : index
    %c4 = arith.constant 4 : index
    %28 = vector.load %arg2[%c0_19, %c4] : memref<4x9xf32, #tpu.memory_space<vmem>>, vector<4x1xf32>
    %29 = vector.broadcast %28 : vector<4x1xf32> to vector<4x288xf32>
    %30 = arith.mulf %27, %29 : vector<4x288xf32>
    %31 = arith.addf %25, %30 : vector<4x288xf32>
    %c0_20 = arith.constant 0 : index
    %c0_21 = arith.constant 0 : index
    %c20 = arith.constant 20 : index
    %32 = vector.load %arg1[%c0_20, %c0_21, %c20] : memref<1x4x326xf32, #tpu.memory_space<vmem>>, vector<1x4x288xf32>
    %33 = vector.shape_cast %32 : vector<1x4x288xf32> to vector<4x288xf32>
    %c0_22 = arith.constant 0 : index
    %c5 = arith.constant 5 : index
    %34 = vector.load %arg2[%c0_22, %c5] : memref<4x9xf32, #tpu.memory_space<vmem>>, vector<4x1xf32>
    %35 = vector.broadcast %34 : vector<4x1xf32> to vector<4x288xf32>
    %36 = arith.mulf %33, %35 : vector<4x288xf32>
    %37 = arith.addf %31, %36 : vector<4x288xf32>
    %c0_23 = arith.constant 0 : index
    %c0_24 = arith.constant 0 : index
    %c36 = arith.constant 36 : index
    %38 = vector.load %arg1[%c0_23, %c0_24, %c36] : memref<1x4x326xf32, #tpu.memory_space<vmem>>, vector<1x4x288xf32>
    %39 = vector.shape_cast %38 : vector<1x4x288xf32> to vector<4x288xf32>
    %c0_25 = arith.constant 0 : index
    %c6 = arith.constant 6 : index
    %40 = vector.load %arg2[%c0_25, %c6] : memref<4x9xf32, #tpu.memory_space<vmem>>, vector<4x1xf32>
    %41 = vector.broadcast %40 : vector<4x1xf32> to vector<4x288xf32>
    %42 = arith.mulf %39, %41 : vector<4x288xf32>
    %43 = arith.addf %37, %42 : vector<4x288xf32>
    %c0_26 = arith.constant 0 : index
    %c0_27 = arith.constant 0 : index
    %c37 = arith.constant 37 : index
    %44 = vector.load %arg1[%c0_26, %c0_27, %c37] : memref<1x4x326xf32, #tpu.memory_space<vmem>>, vector<1x4x288xf32>
    %45 = vector.shape_cast %44 : vector<1x4x288xf32> to vector<4x288xf32>
    %c0_28 = arith.constant 0 : index
    %c7 = arith.constant 7 : index
    %46 = vector.load %arg2[%c0_28, %c7] : memref<4x9xf32, #tpu.memory_space<vmem>>, vector<4x1xf32>
    %47 = vector.broadcast %46 : vector<4x1xf32> to vector<4x288xf32>
    %48 = arith.mulf %45, %47 : vector<4x288xf32>
    %49 = arith.addf %43, %48 : vector<4x288xf32>
    %c0_29 = arith.constant 0 : index
    %c0_30 = arith.constant 0 : index
    %c38 = arith.constant 38 : index
    %50 = vector.load %arg1[%c0_29, %c0_30, %c38] : memref<1x4x326xf32, #tpu.memory_space<vmem>>, vector<1x4x288xf32>
    %51 = vector.shape_cast %50 : vector<1x4x288xf32> to vector<4x288xf32>
    %c0_31 = arith.constant 0 : index
    %c8 = arith.constant 8 : index
    %52 = vector.load %arg2[%c0_31, %c8] : memref<4x9xf32, #tpu.memory_space<vmem>>, vector<4x1xf32>
    %53 = vector.broadcast %52 : vector<4x1xf32> to vector<4x288xf32>
    %54 = arith.mulf %51, %53 : vector<4x288xf32>
    %55 = arith.addf %49, %54 : vector<4x288xf32>
    %c0_32 = arith.constant 0 : index
    %c0_33 = arith.constant 0 : index
    %56 = vector.load %arg3[%c0_32, %c0_33] : memref<8x4xf32, #tpu.memory_space<vmem>>, vector<8x1xf32>
    %57 = vector.extract_strided_slice %55 {offsets = [0, 0], sizes = [1, 288], strides = [1, 1]} : vector<4x288xf32> to vector<1x288xf32>
    %58 = vector.broadcast %57 : vector<1x288xf32> to vector<8x288xf32>
    %59 = vector.broadcast %56 : vector<8x1xf32> to vector<8x288xf32>
    %60 = arith.mulf %58, %59 : vector<8x288xf32>
    %61 = arith.addf %2, %60 : vector<8x288xf32>
    %c0_34 = arith.constant 0 : index
    %c1_35 = arith.constant 1 : index
    %62 = vector.load %arg3[%c0_34, %c1_35] : memref<8x4xf32, #tpu.memory_space<vmem>>, vector<8x1xf32>
    %63 = vector.extract_strided_slice %55 {offsets = [1, 0], sizes = [1, 288], strides = [1, 1]} : vector<4x288xf32> to vector<1x288xf32>
    %64 = vector.broadcast %63 : vector<1x288xf32> to vector<8x288xf32>
    %65 = vector.broadcast %62 : vector<8x1xf32> to vector<8x288xf32>
    %66 = arith.mulf %64, %65 : vector<8x288xf32>
    %67 = arith.addf %61, %66 : vector<8x288xf32>
    %c0_36 = arith.constant 0 : index
    %c2_37 = arith.constant 2 : index
    %68 = vector.load %arg3[%c0_36, %c2_37] : memref<8x4xf32, #tpu.memory_space<vmem>>, vector<8x1xf32>
    %69 = vector.extract_strided_slice %55 {offsets = [2, 0], sizes = [1, 288], strides = [1, 1]} : vector<4x288xf32> to vector<1x288xf32>
    %70 = vector.broadcast %69 : vector<1x288xf32> to vector<8x288xf32>
    %71 = vector.broadcast %68 : vector<8x1xf32> to vector<8x288xf32>
    %72 = arith.mulf %70, %71 : vector<8x288xf32>
    %73 = arith.addf %67, %72 : vector<8x288xf32>
    %c0_38 = arith.constant 0 : index
    %c3_39 = arith.constant 3 : index
    %74 = vector.load %arg3[%c0_38, %c3_39] : memref<8x4xf32, #tpu.memory_space<vmem>>, vector<8x1xf32>
    %75 = vector.extract_strided_slice %55 {offsets = [3, 0], sizes = [1, 288], strides = [1, 1]} : vector<4x288xf32> to vector<1x288xf32>
    %76 = vector.broadcast %75 : vector<1x288xf32> to vector<8x288xf32>
    %77 = vector.broadcast %74 : vector<8x1xf32> to vector<8x288xf32>
    %78 = arith.mulf %76, %77 : vector<8x288xf32>
    %79 = arith.addf %73, %78 : vector<8x288xf32>
    %c0_40 = arith.constant 0 : index
    %c0_41 = arith.constant 0 : index
    %c0_42 = arith.constant 0 : index
    %80 = vector.load %arg5[%c0_40, %c0_41, %c0_42] : memref<1x8x288xf32, #tpu.memory_space<vmem>>, vector<1x8x288xf32>
    %81 = vector.shape_cast %80 : vector<1x8x288xf32> to vector<8x288xf32>
    %82 = vector.shape_cast %79 : vector<8x288xf32> to vector<1x8x288xf32>
    tpu.vector_store %arg5[%c0_40, %c0_41, %c0_42], %82 {strides = array<i32>} : memref<1x8x288xf32, #tpu.memory_space<vmem>>, vector<1x8x288xf32>,
    return
  }
  func.func @transform_0(%arg0: i32) -> (i32, i32, i32) {
    %c0_i32 = arith.constant 0 : i32
    %c0_i32_0 = arith.constant 0 : i32
    %c0_i32_1 = arith.constant 0 : i32
    return %arg0, %c0_i32, %c0_i32_0 : i32, i32, i32
  }
  func.func @transform_1(%arg0: i32) -> (i32, i32) {
    %c0_i32 = arith.constant 0 : i32
    %c0_i32_0 = arith.constant 0 : i32
    %c0_i32_1 = arith.constant 0 : i32
    return %c0_i32, %c0_i32_0 : i32, i32
  }
  func.func @transform_2(%arg0: i32) -> (i32, i32) {
    %c0_i32 = arith.constant 0 : i32
    %c0_i32_0 = arith.constant 0 : i32
    %c0_i32_1 = arith.constant 0 : i32
    return %c0_i32, %c0_i32_0 : i32, i32
  }
  func.func @transform_3(%arg0: i32) -> (i32, i32) {
    %c0_i32 = arith.constant 0 : i32
    %c0_i32_0 = arith.constant 0 : i32
    %c0_i32_1 = arith.constant 0 : i32
    return %c0_i32, %c0_i32_0 : i32, i32
  }
  func.func @transform_4(%arg0: i32) -> (i32, i32, i32) {
    %c0_i32 = arith.constant 0 : i32
    %c0_i32_0 = arith.constant 0 : i32
    %c0_i32_1 = arith.constant 0 : i32
    return %arg0, %c0_i32, %c0_i32_0 : i32, i32, i32
  }
}

</mosaic_0001>

<bundles_post_ra>
// kernel: tpu_custom_call.1
= control target key start
LH: loop header
LB: loop body
LE: loop exit
PB: predicated region body
PF: predicated region fallthrough
CT: control target
= control target key end

     0   :  { %9 = vsyncpa [#allocation3], 0  ;;  %s1138_s0 = inlined_call_operand.hbm [shape: f32[2,4,326], index: 0, kind: input, shape index: {}]   ;;  %s1139_s1 = inlined_call_operand.vmem [shape: f32[4,9], index: 1, kind: input, shape index: {}]   ;;  %s1140_s2 = inlined_call_operand.vmem [shape: f32[8,4], index: 2, kind: input, shape index: {}]   ;;  %s1141_s3 = inlined_call_operand.vmem [shape: f32[8,1], index: 3, kind: input, shape index: {}]   ;;  %s1142_s4 = inlined_call_operand.hbm [shape: f32[2,8,288], index: 4, kind: output, shape index: {}]  }
   0x1   :  { %11 = vsyncpa [#allocation3 + $0x1], 0 }
   0x2   :  { %12 = vsyncpa [#allocation4], 0 }
   0x3   :  { %14 = vsyncpa [#allocation4 + $0x1], 0  ;;  %s937_s15 = smov 0   ;;  %s939_s16 = smov 0  }
   0x4   :  { %s941_s17 = smov 0   ;;  %s943_s18 = smov 0  }
   0x5 LB: > { %s958_s19 = sadd.s32 4294967295, %s890_s18   ;;  %s703_s20 = sadd.s32 4294967294, %s890_s18   ;;  %s890_s18 = sphi %s943_s18, %s1156_s18   ;;  %s886_s17 = sphi %s941_s17, %s1155_s17   ;;  %s882_s16 = sphi %s939_s16, %s1154_s16   ;;  %s878_s15 = sphi %s937_s15, %s1153_s15  }
   0x6   : > { %s962_s21 = sadd.s32 1, %s890_s18   ;;  %s27_s22 = sadd.s32 1, %s886_s17 }
   0x7   : > { %s24_s23 = ssub.s32 %s890_s18, %s962_s21  ;;  %p34_p0 = scmp.ne.s32.totalorder %s886_s17, %s882_s16 }
   0x8   : > { %p25_p1 = scmp.eq.s32.totalorder %s24_s23, 0  ;;  %p35_p2 = scmp.eq.s32.totalorder %s890_s18, 0 }
   0x9   : > { %p40_p3 = scmp.ne.s32.totalorder %s882_s16, %s878_s15  ;;  %p41_p4 = scmp.eq.s32.totalorder %s958_s19, 0 }
   0xa   : > { %s974_s24 = scalar_select %p25_p1, %s886_s17, %s27_s22  }
   0xb   : > { %p36_p5 = por %p35_p2, %p34_p0  ;;  %p976_p6 = por %p41_p4, %p40_p3 }
   0xc   : > { %p127_p7 = scmp.eq.s32.totalorder %s958_s19, 1  ;;  %p133_p8 = scmp.eq.s32.totalorder %s703_s20, 1 }
   0xd   : > { %p728_p10 = scmp.lt.s32.totalorder %s890_s18, 2  ;;  %s162_s28 = sand.u32 1, %s886_s17  }
   0xe   : > { %p983_p11 = por %p127_p7, %p34_p0  ;;  %p987_p12 = por %p133_p8, %p40_p3 }
   0xf   : > { %s712_s29 = smul.u32 192, %s890_s18  ;;  %p998_p13 = pnand %p728_p10, %p36_p5 }
  0x10   : > { %s1145_s26 = scalar_select %p983_p11, 1, 0 }
  0x11   : > { %s1146_s27 = scalar_select %p987_p12, 1, 0 }
  0x12   : > { %s711_s30 = smul.u32 12, %s162_s28  ;;  %s996_s7 = scalar_lea.hbm %s1138_s0, %s712_s29 }
  0x13   : > { %s163_s11 = scalar_lea.sflag [#allocation3], %s162_s28  ;;  %s794_s12 = scalar_lea.hbm %s996_s7, 192 }
  0x14   : > { %s166_s9 = scalar_lea.vmem [#allocation2], %s711_s30  ;;  %p795_p2 = scmp.ne.s32.totalorder %s996_s7, %s794_s12 }
  0x15   : > { %s174_s10 = sshll.u32 %s166_s9, 4  ;;  %p796_p3 = pneg %p998_p13  ;;  %s1003_s10 = int_to_ptr.vmem [resolvable:$true] %s174_s10 }
  0x16   : > { %s799_s20 = scalar_lea.hbm %s1138_s0, 384  ;;  %p800_p7 = scmp.lt.u32.totalorder %s996_s7, %s1138_s0 }
  0x17   : > { %p797_p4 = pnand %p796_p3, %p795_p2  ;;  %p801_p8 = scmp.lt.u32.totalorder %s799_s20, %s794_s12 }
  0x18   : > { %p803_p9 = scmp.lt.u32.totalorder %s794_s12, %s996_s7 }
  0x19   : > { %p798_p5 = pneg %p797_p4  ;;  %p802_p10 = por %p801_p8, %p800_p7 }
  0x1b   : > { %p804_p0 = por %p803_p9, %p802_p10 }
  0x1d   : > { %p805_p1 = pnand %p804_p0, %p798_p5 }
  0x1f   : > { %808 = shalt.err (!%p805_p1)
}
  0x20   : > { %s809_s28 = scalar_lea.vmem %s1003_s10, 192  ;;  %s892_s29 = smov [#allocation2]  }
  0x21   : > { %p810_p2 = scmp.ne.s32.totalorder %s1003_s10, %s809_s28  ;;  %s814_s30 = sshll.u32 %s892_s29, 4  ;;  %s815_s30 = int_to_ptr.vmem [resolvable:$false] %s814_s30 }
  0x22   : > { %s816_s5 = scalar_lea.vmem %s815_s30, 384  ;;  %p817_p11 = scmp.lt.s32.totalorder %s1003_s10, %s815_s30 }
  0x23   : > { %p812_p4 = pnand %p810_p2, %p796_p3  ;;  %p818_p7 = scmp.lt.s32.totalorder %s816_s5, %s809_s28 }
  0x25   : > { %p813_p12 = pneg %p812_p4  ;;  %p819_p8 = por %p818_p7, %p817_p11 }
  0x27   : > { %p820_p9 = pnand %p819_p8, %p813_p12 }
  0x29   : > { %823 = shalt.err (!%p820_p9)
}
  0x2a   : > { %723 = dma.hbm_to_vmem [thread:$0]  (!%p998_p13), %s996_s7, 192, %s1003_s10, %s163_s11  }
  0x2b   : > { %p1148_p0 = scmp.lt.s32.totalorder %s890_s18, 3  ;;  %p1149_p1 = scmp.ge.s32.totalorder %s890_s18, 1 }
  0x2d   : > { %p180_p3 = pnand %p1149_p1, %p1148_p0 }
  0x2e   : > { %s1036_s6 = sand.u32 (!%p180_p3), 1, %s882_s16  }
  0x2f   : > { %183 = sbr.rel (%p180_p3) target bundleno = 382 (0x17e), region = 36  ;;  %s186_s12 = scalar_lea.sflag (!%p180_p3), [#allocation3], %s1036_s6 }
  0x30   : > { %s713_s9 = smul.u32 (!%p180_p3), 12, %s1036_s6 }
  0x32   : > { %s1040_s13 = scalar_lea.vmem (!%p180_p3), [#allocation2], %s713_s9 }
  0x36   : > { %869 = dma.done.wait (%p976_p6), %s186_s12, 192  }
  0x37   : > { %871 = vsyncadd (%p976_p6), %s186_s12, 4294967104  ;;  %v893_v0 = vmov 1   ;;  %v894_v1 = vmov 3   ;;  %v222_v2 = vld [vmem:[%s1139_s1] sm:$0xf]  ;;  %v895_v3 = vmov 2   ;;  %v230_v12 = vlaneseq }
  0x38   : > { %780 = vset.pattern.permute.xlu0 %v893_v0  ;;  %782 = vset.pattern.permute.xlu1 %v894_v1  ;;  %v896_v4 = vmov 4   ;;  %v897_v5 = vmov 5   ;;  %v898_v6 = vmov 6   ;;  %v899_v7 = vmov 7   ;;  %v220_v17 = vld [vmem:[%s1040_s13] sm:$0xff]  ;;  %s903_s25 = smov 127  }
  0x39   : > { %238 = vperm.xlu0 %780, %v222_v2   ;;  %295 = vperm.xlu1 %782, %v222_v2   ;;  %v900_v8 = vmov 0   ;;  %v901_v9 = vmov 8   ;;  %v902_v10 = vmov 839922192   ;;  %v1052_v14 = vshrl.u32 %v230_v12, 7  ;;  %s904_s10 = smov 126  }
  0x3a   : > { %v228_v11 = vunpack.c.l.s4 %v902_v10  ;;  %v221_v21 = vld [vmem:[%s1040_s13 + $0x8] sm:$0xf]  ;;  %s905_s11 = smov 110   ;;  %s906_s14 = smov 109   ;;  %v462_v54 = vld [vmem:[%s1140_s2] sm:$0xff]  ;;  %vm258_vm0 = vcmask 1043456  }
  0x3b   : > { %s907_s20 = smov 108   ;;  %s908_s22 = smov 92   ;;  %v214_v55 = vld [vmem:[%s1141_s3] sm:$0xff]  ;;  %vm260_vm1 = vcmask 1039360   ;;  %vm288_vm2 = vcmask 1031168   ;;  %vm316_vm3 = vcmask 900096  }
  0x3c   : > { %v229_v13 = vunpack.c.0.s8 %v228_v11  ;;  %s909_s23 = smov 91   ;;  %s910_s28 = smov 90   ;;  %vm344_vm4 = vcmask 891904   ;;  %vm372_vm5 = vcmask 883712   ;;  %vm400_vm6 = vcmask 752640  }
  0x3d   : > { %781 = vset.pattern.permute.xlu0 %v895_v3  ;;  %783 = vset.pattern.permute.xlu1 %v896_v4  ;;  %vm428_vm7 = vcmask 744448   ;;  %vm456_vm8 = vcmask 736256   ;;  %s714_s12 = smul.u32 24, %s1036_s6  ;;  %vm616_vm9 = vcmask 261120   ;;  %p1150_p11 = scmp.ne.s32.totalorder %s1145_s26, 0 }
  0x3e   : > { %267 = vperm.xlu0 %781, %v222_v2   ;;  %323 = vperm.xlu1 %783, %v222_v2   ;;  %v232_v15 = vsub.s32 %v229_v13, %v1052_v14  ;;  %s715_s13 = smul.u32 384, %s958_s19  ;;  %s619_s19 = scalar_lea.sflag [#allocation4], %s1036_s6 }
  0x3f   : > { %s213_s7 = scalar_lea.vmem [#allocation5], %s714_s12 }
  0x40   : > { %s633_s8 = sshll.u32 %s213_s7, 4  ;;  %s1096_s8 = int_to_ptr.vmem [resolvable:$true] %s633_s8 }
  0x42   : > { %784 = vset.pattern.permute.xlu1 %v897_v5  ;;  %785 = vset.pattern.permute.xlu0 %v898_v6 }
  0x43   : > { %351 = vperm.xlu1 %784, %v222_v2   ;;  %379 = vperm.xlu0 %785, %v222_v2  }
  0x47   : > { %786 = vset.pattern.permute.xlu1 %v899_v7  ;;  %788 = vset.pattern.permute.xlu0 %v900_v8 }
  0x48   : > { %407 = vperm.xlu1 %786, %v222_v2   ;;  %225 = vperm.xlu0 %788, %v222_v2  }
  0x4c   : > { %787 = vset.pattern.permute.xlu1 %v901_v9 }
  0x4d   : > { %435 = vperm.xlu1 %787, %v222_v2  }
  0x51   : > { %789 = vset.pattern.permute.xlu1 %v900_v8 }
  0xb8   : > { %v239_v16 = vpop.permute.xlu0 %238  ;;  %v296_v18 = vpop.permute.xlu1 %295 }
  0xb9   : > { %v246_v19 = vrot.slane %v239_v16, %v232_v15  ;;  %v303_v25 = vrot.slane %v296_v18, %v232_v15 }
  0xbb   : > { %v248_v20 = vmul.f32 %v246_v19, %v220_v17  ;;  %v249_v26 = vmul.f32 %v246_v19, %v221_v21  ;;  %v305_v29 = vmul.f32 %v303_v25, %v220_v17  ;;  %v306_v35 = vmul.f32 %v303_v25, %v221_v21 }
  0xbd   : > { %v268_v22 = vpop.permute.xlu0 %267  ;;  %252 = vrot.lane.b32.xlu1 %v248_v20, %s903_s25  ;;  %v324_v23 = vpop.permute.xlu1 %323 }
  0xbe   : > { %v275_v24 = vrot.slane %v268_v22, %v232_v15  ;;  %v331_v30 = vrot.slane %v324_v23, %v232_v15 }
  0xc0   : > { %v277_v27 = vmul.f32 %v275_v24, %v220_v17  ;;  %v278_v28 = vmul.f32 %v275_v24, %v221_v21  ;;  %v333_v33 = vmul.f32 %v331_v30, %v220_v17  ;;  %v334_v38 = vmul.f32 %v331_v30, %v221_v21 }
  0xc1   : > { %254 = vrot.lane.b32.xlu1 %v249_v26, %s903_s25 }
  0xc2   : > { %281 = vrot.lane.b32.xlu0 %v277_v27, %s904_s10  ;;  %v352_v31 = vpop.permute.xlu1 %351  ;;  %v380_v32 = vpop.permute.xlu0 %379 }
  0xc3   : > { %v359_v34 = vrot.slane %v352_v31, %v232_v15  ;;  %v387_v41 = vrot.slane %v380_v32, %v232_v15 }
  0xc5   : > { %283 = vrot.lane.b32.xlu1 %v278_v28, %s904_s10  ;;  %v361_v40 = vmul.f32 %v359_v34, %v220_v17  ;;  %v362_v44 = vmul.f32 %v359_v34, %v221_v21  ;;  %v389_v45 = vmul.f32 %v387_v41, %v220_v17  ;;  %v390_v48 = vmul.f32 %v387_v41, %v221_v21 }
  0xc6   : > { %309 = vrot.lane.b32.xlu0 %v305_v29, %s905_s11 }
  0xc7   : > { %v226_v36 = vpop.permute.xlu0 %225  ;;  %v408_v39 = vpop.permute.xlu1 %407 }
  0xc8   : > { %v233_v37 = vrot.slane %v226_v36, %v232_v15  ;;  %v415_v46 = vrot.slane %v408_v39, %v232_v15 }
  0xc9   : > { %311 = vrot.lane.b32.xlu1 %v306_v35, %s905_s11  ;;  %s1094_s11 = scalar_lea.hbm %s1142_s4, %s715_s13 }
  0xca   : > { %337 = vrot.lane.b32.xlu0 %v333_v33, %s906_s14  ;;  %v1057_v42 = vmul.f32 %v233_v37, %v220_v17  ;;  %v1059_v43 = vmul.f32 %v233_v37, %v221_v21  ;;  %v417_v49 = vmul.f32 %v415_v46, %v220_v17  ;;  %v418_v51 = vmul.f32 %v415_v46, %v221_v21 }
  0xcc   : > { %v436_v47 = vpop.permute.xlu1 %435 }
  0xcd   : > { %339 = vrot.lane.b32.xlu1 %v334_v38, %s906_s14  ;;  %v443_v50 = vrot.slane %v436_v47, %v232_v15  ;;  %s824_s14 = scalar_lea.vmem %s1096_s8, 384 }
  0xce   : > { %365 = vrot.lane.b32.xlu0 %v361_v40, %s907_s20  ;;  %p825_p6 = scmp.ne.s32.totalorder %s1096_s8, %s824_s14 }
  0xcf   : > { %v445_v52 = vmul.f32 %v443_v50, %v220_v17  ;;  %v446_v53 = vmul.f32 %v443_v50, %v221_v21 }
  0xd0   : > { %p826_p12 = pnand %p825_p6, %p1150_p11 }
  0xd1   : > { %367 = vrot.lane.b32.xlu1 %v362_v44, %s907_s20  ;;  %s911_s20 = smov [#allocation5]  }
  0xd2   : > { %393 = vrot.lane.b32.xlu0 %v389_v45, %s908_s22  ;;  %p827_p13 = pneg %p826_p12 }
  0xd5   : > { %395 = vrot.lane.b32.xlu1 %v390_v48, %s908_s22  ;;  %s828_s22 = sshll.u32 %s911_s20, 4  ;;  %s829_s22 = int_to_ptr.vmem [resolvable:$false] %s828_s22 }
  0xd6   : > { %421 = vrot.lane.b32.xlu0 %v417_v49, %s909_s23  ;;  %p831_p5 = scmp.lt.s32.totalorder %s1096_s8, %s829_s22 }
  0xd9   : > { %423 = vrot.lane.b32.xlu1 %v418_v51, %s909_s23  ;;  %s830_s23 = scalar_lea.vmem %s829_s22, 768 }
  0xda   : > { %449 = vrot.lane.b32.xlu0 %v445_v52, %s910_s28  ;;  %p832_p10 = scmp.lt.s32.totalorder %s830_s23, %s824_s14 }
  0xdc   : > { %p833_p2 = por %p832_p10, %p831_p5 }
  0xdd   : > { %451 = vrot.lane.b32.xlu1 %v446_v53, %s910_s28 }
  0xde   : > { %494 = vperm.xlu0 %788, %v462_v54   ;;  %p834_p4 = pnand %p833_p2, %p827_p13 }
  0xe1   : > { %217 = vperm.xlu1 %789, %v214_v55  }
  0xe2   : > { %790 = vset.pattern.permute.xlu0 %v893_v0 }
  0xe3   : > { %531 = vperm.xlu0 %790, %v462_v54  }
  0xe5   : > { %791 = vset.pattern.permute.xlu1 %v895_v3 }
  0xe6   : > { %568 = vperm.xlu1 %791, %v462_v54  }
  0xe7   : > { %793 = vset.pattern.permute.xlu0 %v894_v1 }
  0xea   : > { %792 = vset.pattern.permute.xlu1 %v894_v1 }
  0xeb   : > { %605 = vperm.xlu1 %792, %v462_v54  }
 0x12f   : > { %v253_v56 = vpop.permute.xlu1 %252 }
 0x130   : > { %v256_v0 = vrot.slane %v253_v56, 4 }
 0x133   : > { %v255_v57 = vpop.permute.xlu1 %254 }
 0x134   : > { %v282_v58 = vpop.permute.xlu0 %281  ;;  %v257_v63 = vrot.slane %v255_v57, 4  ;;  %v265_v25 = vadd.f32 %v255_v57, %v1059_v43 }
 0x135   : > { %v285_v4 = vrot.slane %v282_v58, 4 }
 0x136   : > { %v259_v6 = vsel %vm258_vm0, %v256_v0, %v257_v63  ;;  %v546_v0 = vsub.s32 6, %v1052_v14 }
 0x137   : > { %v284_v59 = vpop.permute.xlu1 %283  ;;  %v261_v13 = vsel %vm260_vm1, %v253_v56, %v259_v6  ;;  %v471_v56 = vsub.s32 4, %v1052_v14 }
 0x138   : > { %v310_v60 = vpop.permute.xlu0 %309  ;;  %v286_v5 = vrot.slane %v284_v59, 4  ;;  %v264_v20 = vadd.f32 %v261_v13, %v1057_v42  ;;  %v293_v30 = vadd.f32 %v284_v59, %v265_v25  ;;  %v505_v59 = vsub.s32 1, %v1052_v14 }
 0x139   : > { %v313_v9 = vrot.slane %v310_v60, 4 }
 0x13a   : > { %v287_v8 = vsel %vm258_vm0, %v285_v4, %v286_v5 }
 0x13b   : > { %v312_v61 = vpop.permute.xlu1 %311  ;;  %v289_v18 = vsel %vm288_vm2, %v282_v58, %v287_v8  ;;  %v467_v58 = vsub.s32 0, %v1052_v14 }
 0x13c   : > { %v338_v62 = vpop.permute.xlu0 %337  ;;  %v314_v7 = vrot.slane %v312_v61, 4  ;;  %v292_v27 = vadd.f32 %v289_v18, %v264_v20  ;;  %v321_v37 = vadd.f32 %v312_v61, %v293_v30 }
 0x13d   : > { %v341_v10 = vrot.slane %v338_v62, 4 }
 0x13e   : > { %v315_v15 = vsel %vm258_vm0, %v313_v9, %v314_v7 }
 0x13f   : > { %v340_v2 = vpop.permute.xlu1 %339  ;;  %v317_v26 = vsel %vm316_vm3, %v310_v60, %v315_v15  ;;  %v509_v60 = vsub.s32 5, %v1052_v14 }
 0x140   : > { %v366_v3 = vpop.permute.xlu0 %365  ;;  %v342_v11 = vrot.slane %v340_v2, 4  ;;  %v320_v33 = vadd.f32 %v317_v26, %v292_v27  ;;  %v349_v42 = vadd.f32 %v340_v2, %v321_v37  ;;  %v542_v2 = vsub.s32 2, %v1052_v14 }
 0x141   : > { %v369_v16 = vrot.slane %v366_v3, 4 }
 0x142   : > { %v343_v21 = vsel %vm258_vm0, %v341_v10, %v342_v11  ;;  %v579_v10 = vsub.s32 3, %v1052_v14  ;;  %v583_v11 = vsub.s32 7, %v1052_v14 }
 0x143   : > { %v368_v1 = vpop.permute.xlu1 %367  ;;  %v345_v31 = vsel %vm344_vm4, %v338_v62, %v343_v21 }
 0x144   : > { %v394_v12 = vpop.permute.xlu0 %393  ;;  %v370_v17 = vrot.slane %v368_v1, 4  ;;  %v348_v39 = vadd.f32 %v345_v31, %v320_v33  ;;  %v377_v47 = vadd.f32 %v368_v1, %v349_v42 }
 0x145   : > { %v397_v22 = vrot.slane %v394_v12, 4 }
 0x146   : > { %v371_v28 = vsel %vm258_vm0, %v369_v16, %v370_v17 }
 0x147   : > { %v396_v19 = vpop.permute.xlu1 %395  ;;  %v373_v38 = vsel %vm372_vm5, %v366_v3, %v371_v28 }
 0x148   : > { %v398_v23 = vrot.slane %v396_v19, 4  ;;  %v422_v24 = vpop.permute.xlu0 %421  ;;  %v376_v45 = vadd.f32 %v373_v38, %v348_v39  ;;  %v405_v51 = vadd.f32 %v396_v19, %v377_v47 }
 0x149   : > { %v425_v29 = vrot.slane %v422_v24, 4 }
 0x14a   : > { %v399_v34 = vsel %vm258_vm0, %v397_v22, %v398_v23 }
 0x14b   : > { %v424_v32 = vpop.permute.xlu1 %423  ;;  %v401_v43 = vsel %vm400_vm6, %v394_v12, %v399_v34 }
 0x14c   : > { %v426_v35 = vrot.slane %v424_v32, 4  ;;  %v450_v36 = vpop.permute.xlu0 %449  ;;  %v404_v49 = vadd.f32 %v401_v43, %v376_v45  ;;  %v433_v54 = vadd.f32 %v424_v32, %v405_v51 }
 0x14d   : > { %v453_v41 = vrot.slane %v450_v36, 4 }
 0x14e   : > { %v427_v40 = vsel %vm258_vm0, %v425_v29, %v426_v35 }
 0x14f   : > { %v452_v44 = vpop.permute.xlu1 %451  ;;  %v429_v48 = vsel %vm428_vm7, %v422_v24, %v427_v40 }
 0x150   : > { %v454_v46 = vrot.slane %v452_v44, 4  ;;  %v432_v53 = vadd.f32 %v429_v48, %v404_v49  ;;  %v461_v57 = vadd.f32 %v452_v44, %v433_v54 }
 0x152   : > { %v455_v50 = vsel %vm258_vm0, %v453_v41, %v454_v46  ;;  %v476_v63 = vrot.slane %v461_v57, %v467_v58  ;;  %v514_v6 = vrot.slane %v461_v57, %v505_v59  ;;  %v551_v9 = vrot.slane %v461_v57, %v542_v2 }
 0x153   : > { %v457_v52 = vsel %vm456_vm8, %v450_v36, %v455_v50  ;;  %v588_v26 = vrot.slane %v461_v57, %v579_v10 }
 0x154   : > { %v460_v55 = vadd.f32 %v457_v52, %v432_v53  ;;  %v491_v8 = vrot.slane %v476_v63, %v467_v58  ;;  %v529_v21 = vrot.slane %v514_v6, %v505_v59  ;;  %v566_v31 = vrot.slane %v551_v9, %v542_v2 }
 0x155   : > { %v603_v43 = vrot.slane %v588_v26, %v579_v10 }
 0x156   : > { %v468_v61 = vrot.slane %v460_v55, %v467_v58  ;;  %v472_v62 = vrot.slane %v460_v55, %v471_v56  ;;  %v506_v5 = vrot.slane %v460_v55, %v505_v59  ;;  %v510_v3 = vrot.slane %v460_v55, %v509_v60 }
 0x157   : > { %v543_v16 = vrot.slane %v460_v55, %v542_v2  ;;  %v547_v17 = vrot.slane %v460_v55, %v546_v0  ;;  %v580_v33 = vrot.slane %v460_v55, %v579_v10  ;;  %v584_v34 = vrot.slane %v460_v55, %v583_v11 }
 0x158   : > { %v483_v7 = vrot.slane %v468_v61, %v467_v58  ;;  %v487_v1 = vrot.slane %v472_v62, %v467_v58  ;;  %v521_v19 = vrot.slane %v506_v5, %v505_v59  ;;  %v525_v20 = vrot.slane %v510_v3, %v505_v59 }
 0x159   : > { %v558_v29 = vrot.slane %v543_v16, %v542_v2  ;;  %v562_v14 = vrot.slane %v547_v17, %v542_v2  ;;  %v595_v41 = vrot.slane %v580_v33, %v579_v10  ;;  %v599_v42 = vrot.slane %v584_v34, %v579_v10 }
 0x15d   : > { %v495_v4 = vpop.permute.xlu0 %494 }
 0x15e   : > { %v497_v12 = vmul.f32 %v495_v4, %v483_v7  ;;  %v498_v13 = vmul.f32 %v495_v4, %v487_v1  ;;  %v499_v18 = vmul.f32 %v495_v4, %v491_v8 }
 0x160   : > { %v218_v15 = vpop.permute.xlu1 %217 }
 0x161   : > { %v500_v27 = vadd.f32 %v497_v12, %v218_v15  ;;  %v501_v28 = vadd.f32 %v498_v13, %v218_v15  ;;  %v502_v30 = vadd.f32 %v499_v18, %v218_v15 }
 0x162   : > { %v532_v22 = vpop.permute.xlu0 %531 }
 0x163   : > { %v534_v23 = vmul.f32 %v532_v22, %v521_v19  ;;  %v535_v24 = vmul.f32 %v532_v22, %v525_v20  ;;  %v536_v25 = vmul.f32 %v532_v22, %v529_v21 }
 0x165   : > { %v569_v32 = vpop.permute.xlu1 %568  ;;  %v537_v35 = vadd.f32 %v534_v23, %v500_v27  ;;  %v538_v36 = vadd.f32 %v535_v24, %v501_v28  ;;  %v539_v39 = vadd.f32 %v536_v25, %v502_v30 }
 0x166   : > { %v571_v37 = vmul.f32 %v569_v32, %v558_v29  ;;  %v572_v38 = vmul.f32 %v569_v32, %v562_v14  ;;  %v573_v40 = vmul.f32 %v569_v32, %v566_v31 }
 0x168   : > { %v574_v44 = vadd.f32 %v571_v37, %v537_v35  ;;  %v575_v45 = vadd.f32 %v572_v38, %v538_v36  ;;  %v576_v47 = vadd.f32 %v573_v40, %v539_v39 }
 0x16a   : > { %v606_v46 = vpop.permute.xlu1 %605 }
 0x16b   : > { %v608_v48 = vmul.f32 %v606_v46, %v595_v41  ;;  %v609_v49 = vmul.f32 %v606_v46, %v599_v42  ;;  %v610_v50 = vmul.f32 %v606_v46, %v603_v43 }
 0x16d   : > { %v611_v51 = vadd.f32 %v608_v48, %v574_v44  ;;  %v612_v52 = vadd.f32 %v609_v49, %v575_v45  ;;  %v613_v53 = vadd.f32 %v610_v50, %v576_v47 }
 0x16f   : > { %614 = vst [vmem:[%s213_s7] sm:$0xff] %v611_v51  ;;  %615 = vst [vmem:[%s213_s7 + $0x8] sm:$0xff] %v612_v52 }
 0x170   : > { %617 = vst.msk [vmem:[%s213_s7 + $0x10] sm:$0xff] %vm616_vm9, %v613_v53 }
 0x171   : > { %837 = shalt.err (!%p834_p4)
}
 0x172   : > { %s838_s6 = scalar_lea.hbm %s1094_s11, 384  ;;  %s842_s30 = scalar_lea.hbm %s1142_s4, 768 }
 0x173   : > { %p839_p7 = scmp.ne.s32.totalorder %s1094_s11, %s838_s6  ;;  %p843_p0 = scmp.lt.u32.totalorder %s1094_s11, %s1142_s4 }
 0x174   : > { %p844_p1 = scmp.lt.u32.totalorder %s842_s30, %s838_s6  ;;  %p846_p6 = scmp.lt.u32.totalorder %s838_s6, %s1094_s11 }
 0x175   : > { %p840_p8 = pnand %p839_p7, %p1150_p11 }
 0x176   : > { %p845_p3 = por %p844_p1, %p843_p0 }
 0x177   : > { %p841_p9 = pneg %p840_p8 }
 0x178   : > { %p847_p12 = por %p846_p6, %p845_p3 }
 0x17a   : > { %p848_p13 = pnand %p847_p12, %p841_p9 }
 0x17c   : > { %851 = shalt.err (!%p848_p13)
}
 0x17d   : > { %718 = dma.vmem_to_hbm [thread:$0]  (%p1150_p11), %s1096_s8, 384, %s1094_s11, %s619_s19  }
 0x17e PF: > { %s645_s12 = sand.u32 1, %s878_s15   ;;  %p1151_p5 = scmp.ne.s32.totalorder %s1146_s27, 0 }
 0x17f   : > { %p1152_p10 = scmp.ge.s32.totalorder %s890_s18, 2  ;;  %s646_s13 = scalar_lea.sflag [#allocation4], %s645_s12 }
 0x181   : > { %p725_p2 = pnand %p1152_p10, %p1151_p5 }
 0x183   : > { %873 = dma.done.wait (!%p725_p2), %s646_s13, 384  }
 0x184   : > { %875 = vsyncadd (!%p725_p2), %s646_s13, 4294966912  ;;  %p17_p4 = scmp.ge.s32.totalorder %s962_s21, 4   ;;  %s1153_s15 = smov %s882_s16 }
 0x185   : > { %s1154_s16 = smov %s886_s17  ;;  %s1155_s17 = smov %s974_s24 }
 0x186   : > { %s1156_s18 = smov %s962_s21  ;;  %19 = sbr.rel (!%p17_p4) target bundleno = 5 (0x5), region = 81 }
 0x18d   :  { %651 = vsyncpa [#allocation3], 1 }
 0x18e   :  { %653 = vsyncpa [#allocation3 + $0x1], 1 }
 0x18f   :  { %654 = vsyncpa [#allocation4], 1 }
 0x190   :  { %656 = vsyncpa [#allocation4 + $0x1], 1 }

</bundles_post_ra>
